<compile_context>
chip_gen: v6e
topology: v6e:2x2x1
jax: 0.10.0
libtpu: 0.0.40
codegen_flags: <defaults>
</compile_context>

<pallas_src>
import functools

import jax
import jax.numpy as jnp
from jax.experimental import pallas as pl
from jax.experimental.pallas import tpu as pltpu


def _rope_kernel(cos_ref, sin_ref, x_ref, o_ref, *, half):
    """cos_ref/sin_ref: (st, half) f32 tables; x_ref/o_ref: (st, B, C)."""
    cos = cos_ref[...][:, None, :]          # (st, 1, half) f32, sublane-broadcast over B
    sin = sin_ref[...][:, None, :]

    x = x_ref[...]                          # (st, B, C)
    x1 = x[:, :, :half]
    x2 = x[:, :, half:]

    # f32 math (bf16 x promotes via the f32 tables); cast once at the store.
    o1 = x1 * cos - x2 * sin                # out[..., :half]
    o2 = x2 * cos + x1 * sin                # out[..., half:]

    # Two direct half-stores (masked when half % 128 != 0) -- no concat.
    o_ref[:, :, :half] = o1.astype(o_ref.dtype)
    o_ref[:, :, half:] = o2.astype(o_ref.dtype)


def _pick_seq_tile(seq_len, seq_row_bytes, target_bytes):
    """Seq-tile size: ~target_bytes of x per block, multiple of 8 (or == S),
    preferring an even grid of >= 4 steps so v7x megacore load-balances."""
    if seq_len <= 8:
        return seq_len

    def grid(t):
        return -(-seq_len // t)  # cdiv

    st = max(8, min(seq_len, (target_bytes // max(seq_row_bytes, 1)) // 8 * 8))

    # If the byte-target tile leaves fewer than 4 grid steps, shrink toward
    # ~S/4 (per-step overhead ~0.35us is negligible at these block sizes).
    if grid(st) < 4:
        quarter = max(8, ((-(-seq_len // 4)) // 8) * 8)
        if quarter < st:
            st = quarter

    # Prefer an even number of grid steps (both v7x TensorCores busy).
    if grid(st) > 1 and grid(st) % 2 == 1:
        for cand in range(st, 7, -8):
            if grid(cand) % 2 == 0:
                st = cand
                break
    return st


def rotary_positional_encoding(x, *, base=10000.0,
                               target_block_bytes=4 * 1024 * 1024):
    """x: (seq, batch, channels). Returns RoPE-rotated x, same shape/dtype."""
    S, B, C = x.shape
    if C % 2:
        raise ValueError("channels must be even")
    half = C // 2

    # Precompute f32 cos/sin tables once per sequence position (trig hoisted
    # out of the per-row kernel path).  Exact for S < 2^24.
    inv_freq = 1.0 / (base ** (jnp.arange(0, C, 2, dtype=jnp.float32) / C))
    t = jnp.arange(S, dtype=jnp.float32)
    phase = t[:, None] * inv_freq[None, :]          # (S, half)
    cos_tbl = jnp.cos(phase)                        # (S, half) f32
    sin_tbl = jnp.sin(phase)

    seq_row_bytes = B * C * x.dtype.itemsize
    st = _pick_seq_tile(S, seq_row_bytes, target_block_bytes)
    grid = (pl.cdiv(S, st),)                        # ragged last block OK

    # VMEM budget: double-buffered x + out blocks + cos/sin blocks + headroom.
    x_block_bytes = st * B * C * x.dtype.itemsize
    tbl_block_bytes = st * half * 4
    vmem_needed = 2 * (2 * x_block_bytes + 2 * tbl_block_bytes) + (2 << 20)
    vmem_limit = int(min(max(vmem_needed, 8 << 20), 100 << 20))

    kernel = functools.partial(_rope_kernel, half=half)

    out = pl.pallas_call(
        kernel,
        out_shape=jax.ShapeDtypeStruct((S, B, C), x.dtype),
        grid_spec=pltpu.PrefetchScalarGridSpec(
            num_scalar_prefetch=0,
            grid=grid,
            in_specs=[
                pl.BlockSpec((st, half), lambda i: (i, 0)),     # cos table
                pl.BlockSpec((st, half), lambda i: (i, 0)),     # sin table
                pl.BlockSpec((st, B, C), lambda i: (i, 0, 0)),  # x
            ],
            out_specs=pl.BlockSpec((st, B, C), lambda i: (i, 0, 0)),
        ),
        compiler_params=pltpu.CompilerParams(
            dimension_semantics=("parallel",),
            vmem_limit_bytes=vmem_limit,
        ),
    )(cos_tbl, sin_tbl, x)

    return out


def _reference(x, base=10000.0):
    # Pure-JAX mirror of the PyTorch forward.
    S, _, C = x.shape
    inv_freq = 1.0 / (base ** (jnp.arange(0, C, 2, dtype=jnp.float32) / C))
    t = jnp.arange(S, dtype=jnp.float32)
    freqs = jnp.einsum("i,j->ij", t, inv_freq)
    emb = jnp.concatenate([freqs, freqs], axis=-1)
    cos_e = jnp.cos(emb)[:, None, :]
    sin_e = jnp.sin(emb)[:, None, :]
    x1, x2 = x[..., : C // 2], x[..., C // 2:]
    rot = jnp.concatenate([-x2, x1], axis=-1)
    return x * cos_e + rot * sin_e


if __name__ == "__main__":
    key = jax.random.PRNGKey(0)

    # (seq, batch, channels): the small shape exercises the unaligned-half
    # (masked half-store) path; channels=256 exercises the lane-aligned path
    # plus a >1-step grid; the third shape exercises the ragged last block.
    for shape in [(8, 2, 32), (16, 2, 256), (20, 2, 64)]:
        key, sub = jax.random.split(key)
        x = jax.random.normal(sub, shape, dtype=jnp.float32)

        out = jax.block_until_ready(rotary_positional_encoding(x))
        ref = _reference(x)

        assert out.shape == x.shape and out.dtype == x.dtype
        assert jnp.allclose(out, ref, atol=1e-4, rtol=1e-4), (
            shape, float(jnp.max(jnp.abs(out - ref))))

    print("KERNEL_OK")
</pallas_src>

<mosaic_0001>
module attributes {stable_mosaic.version = 11 : i64} {
  func.func @_rope_kernel(%arg0: i32, %arg1: memref<8x16xf32, #tpu.memory_space<vmem>>, %arg2: memref<8x16xf32, #tpu.memory_space<vmem>>, %arg3: memref<8x2x32xf32, #tpu.memory_space<vmem>>, %arg4: memref<8x2x32xf32, #tpu.memory_space<vmem>>) attributes {dimension_semantics = [#tpu.dimension_semantics<parallel>], iteration_bounds = array<i64: 1>, scalar_prefetch = 0 : i64, scratch_operands = 0 : i64, tpu.core_type = #tpu.core_type<tc>, window_params = [{transform_indices = @transform_0, window_bounds = array<i64: 8, 16>}, {transform_indices = @transform_1, window_bounds = array<i64: 8, 16>}, {transform_indices = @transform_2, window_bounds = array<i64: 8, 2, 32>}, {transform_indices = @transform_3, window_bounds = array<i64: 8, 2, 32>}]} {
    %c0 = arith.constant 0 : index
    %c0_0 = arith.constant 0 : index
    %0 = vector.load %arg1[%c0, %c0_0] : memref<8x16xf32, #tpu.memory_space<vmem>>, vector<8x16xf32>
    %1 = vector.shape_cast %0 : vector<8x16xf32> to vector<8x1x16xf32>
    %c0_1 = arith.constant 0 : index
    %c0_2 = arith.constant 0 : index
    %2 = vector.load %arg2[%c0_1, %c0_2] : memref<8x16xf32, #tpu.memory_space<vmem>>, vector<8x16xf32>
    %3 = vector.shape_cast %2 : vector<8x16xf32> to vector<8x1x16xf32>
    %c0_3 = arith.constant 0 : index
    %c0_4 = arith.constant 0 : index
    %c0_5 = arith.constant 0 : index
    %4 = vector.load %arg3[%c0_3, %c0_4, %c0_5] : memref<8x2x32xf32, #tpu.memory_space<vmem>>, vector<8x2x32xf32>
    %5 = vector.extract_strided_slice %4 {offsets = [0, 0, 0], sizes = [8, 2, 16], strides = [1, 1, 1]} : vector<8x2x32xf32> to vector<8x2x16xf32>
    %6 = vector.extract_strided_slice %4 {offsets = [0, 0, 16], sizes = [8, 2, 16], strides = [1, 1, 1]} : vector<8x2x32xf32> to vector<8x2x16xf32>
    %7 = vector.broadcast %1 : vector<8x1x16xf32> to vector<8x2x16xf32>
    %8 = arith.mulf %5, %7 : vector<8x2x16xf32>
    %9 = vector.broadcast %3 : vector<8x1x16xf32> to vector<8x2x16xf32>
    %10 = arith.mulf %6, %9 : vector<8x2x16xf32>
    %11 = arith.subf %8, %10 : vector<8x2x16xf32>
    %12 = vector.broadcast %1 : vector<8x1x16xf32> to vector<8x2x16xf32>
    %13 = arith.mulf %6, %12 : vector<8x2x16xf32>
    %14 = vector.broadcast %3 : vector<8x1x16xf32> to vector<8x2x16xf32>
    %15 = arith.mulf %5, %14 : vector<8x2x16xf32>
    %16 = arith.addf %13, %15 : vector<8x2x16xf32>
    %c0_6 = arith.constant 0 : index
    %c0_7 = arith.constant 0 : index
    %c0_8 = arith.constant 0 : index
    %17 = vector.load %arg4[%c0_6, %c0_7, %c0_8] : memref<8x2x32xf32, #tpu.memory_space<vmem>>, vector<8x2x16xf32>
    tpu.vector_store %arg4[%c0_6, %c0_7, %c0_8], %11 {strides = array<i32>} : memref<8x2x32xf32, #tpu.memory_space<vmem>>, vector<8x2x16xf32>,
    %c0_9 = arith.constant 0 : index
    %c0_10 = arith.constant 0 : index
    %c16 = arith.constant 16 : index
    %18 = vector.load %arg4[%c0_9, %c0_10, %c16] : memref<8x2x32xf32, #tpu.memory_space<vmem>>, vector<8x2x16xf32>
    tpu.vector_store %arg4[%c0_9, %c0_10, %c16], %16 {strides = array<i32>} : memref<8x2x32xf32, #tpu.memory_space<vmem>>, vector<8x2x16xf32>,
    return
  }
  func.func @transform_0(%arg0: i32) -> (i32, i32) {
    %c0_i32 = arith.constant 0 : i32
    %c0_i32_0 = arith.constant 0 : i32
    return %arg0, %c0_i32 : i32, i32
  }
  func.func @transform_1(%arg0: i32) -> (i32, i32) {
    %c0_i32 = arith.constant 0 : i32
    %c0_i32_0 = arith.constant 0 : i32
    return %arg0, %c0_i32 : i32, i32
  }
  func.func @transform_2(%arg0: i32) -> (i32, i32, i32) {
    %c0_i32 = arith.constant 0 : i32
    %c0_i32_0 = arith.constant 0 : i32
    %c0_i32_1 = arith.constant 0 : i32
    return %arg0, %c0_i32, %c0_i32_0 : i32, i32, i32
  }
  func.func @transform_3(%arg0: i32) -> (i32, i32, i32) {
    %c0_i32 = arith.constant 0 : i32
    %c0_i32_0 = arith.constant 0 : i32
    %c0_i32_1 = arith.constant 0 : i32
    return %arg0, %c0_i32, %c0_i32_0 : i32, i32, i32
  }
}

</mosaic_0001>

<bundles_post_ra>
// kernel: tpu_custom_call.1
= control target key start
LH: loop header
LB: loop body
LE: loop exit
PB: predicated region body
PF: predicated region fallthrough
CT: control target
= control target key end

     0   :  { %8 = vsyncpa [#allocation3], 0  ;;  %s713_s0 = inlined_call_operand.hbm [shape: f32[8,16], index: 0, kind: input, shape index: {}]   ;;  %s714_s1 = inlined_call_operand.hbm [shape: f32[8,16], index: 1, kind: input, shape index: {}]   ;;  %s715_s2 = inlined_call_operand.hbm [shape: f32[8,2,32], index: 2, kind: input, shape index: {}]   ;;  %s716_s3 = inlined_call_operand.hbm [shape: f32[8,2,32], index: 3, kind: output, shape index: {}]  }
   0x1   :  { %9 = vsyncpa [#allocation6], 0 }
   0x2   :  { %10 = vsyncpa [#allocation4], 0  ;;  %s535_s12 = smov [#allocation5]   ;;  %s536_s14 = smov [#allocation2]  }
   0x3   :  { %s27_s13 = sshll.u32 %s535_s12, 4  ;;  %s17_s15 = sshll.u32 %s536_s14, 4  ;;  %s28_s13 = int_to_ptr.vmem [resolvable:$true] %s27_s13  ;;  %s18_s15 = int_to_ptr.vmem [resolvable:$true] %s17_s15 }
   0x4   :  { %s457_s16 = scalar_lea.vmem %s28_s13, 128  ;;  %p462_p1 = scmp.lt.s32.totalorder %s28_s13, %s28_s13 }
   0x5   :  { %p458_p0 = scmp.ne.s32.totalorder %s28_s13, %s457_s16  ;;  %p463_p2 = scmp.lt.s32.totalorder %s457_s16, %s457_s16 }
   0x7   :  { %p464_p3 = por %p463_p2, %p462_p1 }
   0x9   :  { %p465_p4 = pnand %p464_p3, %p458_p0 }
   0xb   :  { %468 = shalt.err (!%p465_p4)
}
   0xc   :  { %30 = dma.hbm_to_vmem [thread:$0]  %s714_s1, 128, %s28_s13, [#allocation6]  }
   0xd   :  { %s477_s19 = scalar_lea.vmem %s18_s15, 128  ;;  %p482_p6 = scmp.lt.s32.totalorder %s18_s15, %s18_s15 }
   0xe   :  { %p478_p5 = scmp.ne.s32.totalorder %s18_s15, %s477_s19  ;;  %p483_p7 = scmp.lt.s32.totalorder %s477_s19, %s477_s19 }
  0x10   :  { %p484_p8 = por %p483_p7, %p482_p6 }
  0x12   :  { %p485_p9 = pnand %p484_p8, %p478_p5 }
  0x14   :  { %488 = shalt.err (!%p485_p9)
}
  0x15   :  { %20 = dma.hbm_to_vmem [thread:$0]  %s713_s0, 128, %s18_s15, [#allocation3]  }
  0x16   :  { %s537_s22 = smov [#allocation7]  }
  0x17   :  { %s36_s23 = sshll.u32 %s537_s22, 4  ;;  %s37_s23 = int_to_ptr.vmem [resolvable:$true] %s36_s23 }
  0x18   :  { %s497_s24 = scalar_lea.vmem %s37_s23, 256  ;;  %p502_p11 = scmp.lt.s32.totalorder %s37_s23, %s37_s23 }
  0x19   :  { %p498_p10 = scmp.ne.s32.totalorder %s37_s23, %s497_s24  ;;  %p503_p12 = scmp.lt.s32.totalorder %s497_s24, %s497_s24 }
  0x1b   :  { %p504_p13 = por %p503_p12, %p502_p11 }
  0x1d   :  { %p505_p0 = pnand %p504_p13, %p498_p10 }
  0x1f   :  { %508 = shalt.err (!%p505_p0)
}
  0x20   :  { %s538_s1 = smov 32   ;;  %s539_s25 = smov 2  }
  0x21   :  { %42 = dma.hbm_to_vmem [thread:$0]  %s715_s2, 256, %s37_s23, [#allocation6], %s538_s1, %s538_s1, %s539_s25  }
  0x22   :  { %529 = dma.done.wait [#allocation3], 128  }
  0x23   :  { %530 = vsyncadd [#allocation3], 4294967168 }
  0x24   :  { %531 = dma.done.wait [#allocation6], 384  }
  0x25   :  { %532 = vsyncadd [#allocation6], 4294966912  ;;  %v58_v0 = vlaneseq  ;;  %v540_v1 = vmov 1966171168   ;;  %v103_v6 = vld [vmem:[#allocation5] sm:$0xff]  ;;  %v52_v17 = vld [vmem:[#allocation2] sm:$0xff] }
  0x26   :  { %v56_v2 = vunpack.c.l.s4 %v540_v1  ;;  %v105_v9 = vcombine.high %v103_v6, %v103_v6  ;;  %s541_s0 = smov 16   ;;  %v54_v30 = vcombine.high %v52_v17, %v52_v17  ;;  %v614_v50 = vld [vmem:[#allocation7] sm:$0x3]  ;;  %v620_v52 = vld [vmem:[#allocation7 + $0x2] sm:$0x3]  ;;  %s542_s2 = smov 112  }
  0x27   :  { %v59_v3 = vshrl.u32 %v58_v0, 7  ;;  %v625_v54 = vld [vmem:[#allocation7 + $0x4] sm:$0x3]  ;;  %v630_v56 = vld [vmem:[#allocation7 + $0x6] sm:$0x3]  ;;  %vm402_vm0 = vcmask 123904  }
  0x28   :  { %v57_v4 = vunpack.c.0.s8 %v56_v2  ;;  %v634_v58 = vld [vmem:[#allocation7 + $0x8] sm:$0x3]  ;;  %v638_v60 = vld [vmem:[#allocation7 + $0xa] sm:$0x3]  ;;  %vm411_vm1 = vcmask 255104   ;;  %s543_s28 = smov [#allocation8]  }
  0x29   :  { %v164_v8 = vsub.s32 0, %v59_v3  ;;  %s425_s29 = sshll.u32 %s543_s28, 4  ;;  %s426_s29 = int_to_ptr.vmem [resolvable:$true] %s425_s29 }
  0x2a   :  { %v60_v5 = vsub.s32 %v57_v4, %v59_v3  ;;  %s509_s30 = scalar_lea.vmem %s426_s29, 256  ;;  %p514_p2 = scmp.lt.s32.totalorder %s426_s29, %s426_s29 }
  0x2b   :  { %p510_p1 = scmp.ne.s32.totalorder %s426_s29, %s509_s30  ;;  %p515_p3 = scmp.lt.s32.totalorder %s509_s30, %s509_s30 }
  0x2c   :  { %v112_v7 = vrot.slane %v103_v6, %v60_v5  ;;  %v119_v12 = vrot.slane %v105_v9, %v60_v5  ;;  %v61_v24 = vrot.slane %v52_v17, %v60_v5  ;;  %v68_v35 = vrot.slane %v54_v30, %v60_v5  ;;  %v651_v9 = vld [vmem:[#allocation7 + $0xc] sm:$0x3] }
  0x2d   :  { %p516_p4 = por %p515_p3, %p514_p2 }
  0x2e   :  { %v128_v10 = vrot.slane %v112_v7, %v60_v5  ;;  %v120_v11 = vcombine.high %v112_v7, %v112_v7  ;;  %v121_v16 = vcombine.high %v119_v12, %v119_v12  ;;  %v135_v21 = vrot.slane %v119_v12, %v60_v5 }
  0x2f   :  { %v69_v29 = vcombine.high %v61_v24, %v61_v24  ;;  %v77_v32 = vrot.slane %v61_v24, %v60_v5  ;;  %v70_v40 = vcombine.high %v68_v35, %v68_v35  ;;  %v84_v42 = vrot.slane %v68_v35, %v60_v5  ;;  %p517_p5 = pnand %p516_p4, %p510_p1 }
  0x30   :  { %v213_v13 = vrot.slane %v128_v10, %v164_v8  ;;  %v150_v14 = vcombine.high %v128_v10, %v128_v10  ;;  %v142_v15 = vrot.slane %v120_v11, %v60_v5  ;;  %v149_v23 = vrot.slane %v121_v16, %v60_v5 }
  0x31   :  { %v229_v25 = vrot.slane %v135_v21, %v164_v8  ;;  %v151_v26 = vcombine.high %v135_v21, %v135_v21  ;;  %v91_v34 = vrot.slane %v69_v29, %v60_v5  ;;  %v588_v36 = vrot.slane %v77_v32, %v164_v8 }
  0x32   :  { %250 = vrot.lane.b32.xlu0 %v213_v13, %s541_s0  ;;  %v221_v18 = vrot.slane %v150_v14, %v164_v8  ;;  %v217_v19 = vrot.slane %v142_v15, %v164_v8  ;;  %v152_v20 = vcombine.high %v142_v15, %v142_v15  ;;  %v233_v27 = vrot.slane %v149_v23, %v164_v8 }
  0x33   :  { %v153_v28 = vcombine.high %v149_v23, %v149_v23  ;;  %v581_v31 = vrot.slane %v151_v26, %v164_v8  ;;  %v99_v37 = vcombine.high %v77_v32, %v77_v32  ;;  %v592_v38 = vrot.slane %v91_v34, %v164_v8 }
  0x34   :  { %254 = vrot.lane.b32.xlu1 %v221_v18, %s541_s0  ;;  %v225_v22 = vrot.slane %v152_v20, %v164_v8  ;;  %v101_v39 = vcombine.high %v91_v34, %v91_v34  ;;  %v98_v44 = vrot.slane %v70_v40, %v60_v5  ;;  %v604_v45 = vrot.slane %v84_v42, %v164_v8 }
  0x35   :  { %v584_v33 = vrot.slane %v153_v28, %v164_v8  ;;  %v596_v41 = vrot.slane %v99_v37, %v164_v8  ;;  %v100_v46 = vcombine.high %v84_v42, %v84_v42  ;;  %v354_v53 = vmul.f32 %v213_v13, %v614_v50  ;;  %v654_v13 = vld [vmem:[#allocation7 + $0xe] sm:$0x3] }
  0x36   :  { %252 = vrot.lane.b32.xlu0 %v217_v19, %s541_s0  ;;  %v600_v43 = vrot.slane %v101_v39, %v164_v8  ;;  %v608_v47 = vrot.slane %v98_v44, %v164_v8  ;;  %v102_v48 = vcombine.high %v98_v44, %v98_v44  ;;  %v355_v55 = vmul.f32 %v217_v19, %v620_v52 }
  0x37   :  { %v612_v49 = vrot.slane %v100_v46, %v164_v8  ;;  %v356_v57 = vmul.f32 %v221_v18, %v625_v54  ;;  %v357_v59 = vmul.f32 %v225_v22, %v630_v56  ;;  %v358_v61 = vmul.f32 %v229_v25, %v634_v58 }
  0x38   :  { %256 = vrot.lane.b32.xlu1 %v225_v22, %s541_s0  ;;  %v618_v51 = vrot.slane %v102_v48, %v164_v8  ;;  %v359_v62 = vmul.f32 %v233_v27, %v638_v60  ;;  %v360_v17 = vmul.f32 %v581_v31, %v651_v9  ;;  %v361_v18 = vmul.f32 %v584_v33, %v654_v13 }
  0x39   :  { %v202_v32 = vmul.f32 %v588_v36, %v614_v50  ;;  %v204_v39 = vmul.f32 %v596_v41, %v625_v54  ;;  %v203_v40 = vmul.f32 %v592_v38, %v620_v52 }
  0x3a   :  { %258 = vrot.lane.b32.xlu0 %v229_v25, %s541_s0 }
  0x3c   :  { %260 = vrot.lane.b32.xlu1 %v233_v27, %s541_s0 }
  0x3e   :  { %262 = vrot.lane.b32.xlu0 %v581_v31, %s541_s0 }
  0x40   :  { %264 = vrot.lane.b32.xlu1 %v584_v33, %s541_s0 }
  0x42   :  { %322 = vrot.lane.b32.xlu0 %v588_v36, %s541_s0 }
  0x44   :  { %324 = vrot.lane.b32.xlu1 %v592_v38, %s541_s0 }
  0x46   :  { %326 = vrot.lane.b32.xlu0 %v596_v41, %s541_s0  ;;  %v205_v41 = vmul.f32 %v600_v43, %v630_v56 }
  0x48   :  { %328 = vrot.lane.b32.xlu1 %v600_v43, %s541_s0  ;;  %v208_v43 = vmul.f32 %v612_v49, %v651_v9 }
  0x4a   :  { %330 = vrot.lane.b32.xlu0 %v604_v45, %s541_s0 }
  0x4c   :  { %332 = vrot.lane.b32.xlu1 %v608_v47, %s541_s0 }
  0x4e   :  { %334 = vrot.lane.b32.xlu0 %v612_v49, %s541_s0  ;;  %v209_v49 = vmul.f32 %v618_v51, %v654_v13 }
  0x50   :  { %336 = vrot.lane.b32.xlu1 %v618_v51, %s541_s0 }
  0x52   :  { %370 = vrot.lane.b32.xlu0 %v354_v53, %s541_s0 }
  0x54   :  { %372 = vrot.lane.b32.xlu1 %v355_v55, %s541_s0  ;;  %v206_v55 = vmul.f32 %v604_v45, %v634_v58 }
  0x56   :  { %374 = vrot.lane.b32.xlu0 %v356_v57, %s541_s0 }
  0x58   :  { %376 = vrot.lane.b32.xlu1 %v357_v59, %s541_s0 }
  0x5a   :  { %378 = vrot.lane.b32.xlu0 %v358_v61, %s541_s0 }
  0x5c   :  { %380 = vrot.lane.b32.xlu1 %v359_v62, %s541_s0 }
  0xa4   :  { %v251_v63 = vpop.permute.xlu0 %250 }
  0xa5   :  { %v274_v0 = vmul.f32 %v251_v63, %v614_v50 }
  0xa6   :  { %v255_v1 = vpop.permute.xlu1 %254 }
  0xa7   :  { %290 = vrot.lane.b32.xlu0 %v274_v0, %s542_s2  ;;  %v276_v2 = vmul.f32 %v255_v1, %v625_v54 }
  0xa8   :  { %v253_v3 = vpop.permute.xlu0 %252 }
  0xa9   :  { %v275_v4 = vmul.f32 %v253_v3, %v620_v52 }
  0xaa   :  { %v257_v5 = vpop.permute.xlu1 %256 }
  0xab   :  { %294 = vrot.lane.b32.xlu0 %v276_v2, %s542_s2  ;;  %292 = vrot.lane.b32.xlu1 %v275_v4, %s542_s2  ;;  %v277_v6 = vmul.f32 %v257_v5, %v630_v56 }
  0xac   :  { %v259_v7 = vpop.permute.xlu0 %258 }
  0xad   :  { %v278_v8 = vmul.f32 %v259_v7, %v634_v58 }
  0xae   :  { %v261_v10 = vpop.permute.xlu1 %260 }
  0xaf   :  { %298 = vrot.lane.b32.xlu0 %v278_v8, %s542_s2  ;;  %296 = vrot.lane.b32.xlu1 %v277_v6, %s542_s2  ;;  %v279_v11 = vmul.f32 %v261_v10, %v638_v60 }
  0xb0   :  { %v263_v12 = vpop.permute.xlu0 %262 }
  0xb1   :  { %v280_v14 = vmul.f32 %v263_v12, %v651_v9 }
  0xb2   :  { %v265_v15 = vpop.permute.xlu1 %264 }
  0xb3   :  { %302 = vrot.lane.b32.xlu0 %v280_v14, %s542_s2  ;;  %300 = vrot.lane.b32.xlu1 %v279_v11, %s542_s2  ;;  %v281_v16 = vmul.f32 %v265_v15, %v654_v13 }
  0xb4   :  { %v323_v19 = vpop.permute.xlu0 %322 }
  0xb5   :  { %v346_v33 = vmul.f32 %v323_v19, %v614_v50 }
  0xb6   :  { %v325_v20 = vpop.permute.xlu1 %324 }
  0xb7   :  { %382 = vrot.lane.b32.xlu0 %v360_v17, %s541_s0  ;;  %304 = vrot.lane.b32.xlu1 %v281_v16, %s542_s2  ;;  %v347_v42 = vmul.f32 %v325_v20, %v620_v52 }
  0xb8   :  { %v327_v21 = vpop.permute.xlu0 %326 }
  0xb9   :  { %v348_v44 = vmul.f32 %v327_v21, %v625_v54 }
  0xba   :  { %v329_v22 = vpop.permute.xlu1 %328 }
  0xbb   :  { %384 = vrot.lane.b32.xlu1 %v361_v18, %s541_s0  ;;  %v349_v38 = vmul.f32 %v329_v22, %v630_v56  ;;  %v207_v56 = vmul.f32 %v608_v47, %v638_v60 }
  0xbc   :  { %v331_v23 = vpop.permute.xlu0 %330 }
  0xbd   :  { %v350_v52 = vmul.f32 %v331_v23, %v634_v58 }
  0xbe   :  { %v333_v24 = vpop.permute.xlu1 %332 }
  0xbf   :  { %v351_v58 = vmul.f32 %v333_v24, %v638_v60 }
  0xc0   :  { %v335_v25 = vpop.permute.xlu0 %334 }
  0xc1   :  { %v352_v60 = vmul.f32 %v335_v25, %v651_v9 }
  0xc2   :  { %v664_v26 = vpop.permute.xlu1 %336 }
  0xc3   :  { %v353_v10 = vmul.f32 %v664_v26, %v654_v13 }
  0xc4   :  { %v371_v27 = vpop.permute.xlu0 %370 }
  0xc5   :  { %v394_v46 = vadd.f32 %v371_v27, %v346_v33 }
  0xc6   :  { %v373_v28 = vpop.permute.xlu1 %372 }
  0xc7   :  { %v395_v54 = vadd.f32 %v373_v28, %v347_v42 }
  0xc8   :  { %v375_v29 = vpop.permute.xlu0 %374 }
  0xc9   :  { %v396_v57 = vadd.f32 %v375_v29, %v348_v44 }
  0xca   :  { %v377_v30 = vpop.permute.xlu1 %376 }
  0xcb   :  { %v397_v63 = vadd.f32 %v377_v30, %v349_v38 }
  0xcc   :  { %v379_v31 = vpop.permute.xlu0 %378 }
  0xcd   :  { %v398_v0 = vadd.f32 %v379_v31, %v350_v52 }
  0xce   :  { %v381_v34 = vpop.permute.xlu1 %380 }
  0xcf   :  { %v399_v47 = vadd.f32 %v381_v34, %v351_v58 }
 0x119   :  { %v291_v35 = vpop.permute.xlu0 %290 }
 0x11a   :  { %v314_v37 = vsub.f32 %v202_v32, %v291_v35 }
 0x11c   :  { %403 = vst.msk [vmem:[#allocation8] sm:$0x3] %vm402_vm0, %v314_v37 }
 0x11d   :  { %412 = vst.msk [vmem:[#allocation8] sm:$0x3] %vm411_vm1, %v394_v46  ;;  %v295_v36 = vpop.permute.xlu0 %294  ;;  %v293_v48 = vpop.permute.xlu1 %292 }
 0x11e   :  { %v316_v50 = vsub.f32 %v204_v39, %v295_v36  ;;  %v315_v53 = vsub.f32 %v203_v40, %v293_v48 }
 0x120   :  { %405 = vst.msk [vmem:[#allocation8 + $0x4] sm:$0x3] %vm402_vm0, %v316_v50  ;;  %404 = vst.msk [vmem:[#allocation8 + $0x2] sm:$0x3] %vm402_vm0, %v315_v53 }
 0x121   :  { %414 = vst.msk [vmem:[#allocation8 + $0x4] sm:$0x3] %vm411_vm1, %v396_v57  ;;  %413 = vst.msk [vmem:[#allocation8 + $0x2] sm:$0x3] %vm411_vm1, %v395_v54  ;;  %v299_v59 = vpop.permute.xlu0 %298  ;;  %v297_v61 = vpop.permute.xlu1 %296 }
 0x122   :  { %v318_v45 = vsub.f32 %v206_v55, %v299_v59  ;;  %v317_v62 = vsub.f32 %v205_v41, %v297_v61 }
 0x124   :  { %407 = vst.msk [vmem:[#allocation8 + $0x8] sm:$0x3] %vm402_vm0, %v318_v45  ;;  %406 = vst.msk [vmem:[#allocation8 + $0x6] sm:$0x3] %vm402_vm0, %v317_v62 }
 0x125   :  { %416 = vst.msk [vmem:[#allocation8 + $0x8] sm:$0x3] %vm411_vm1, %v398_v0  ;;  %415 = vst.msk [vmem:[#allocation8 + $0x6] sm:$0x3] %vm411_vm1, %v397_v63  ;;  %v303_v1 = vpop.permute.xlu0 %302  ;;  %v301_v2 = vpop.permute.xlu1 %300 }
 0x126   :  { %v320_v3 = vsub.f32 %v208_v43, %v303_v1  ;;  %v319_v4 = vsub.f32 %v207_v56, %v301_v2 }
 0x128   :  { %409 = vst.msk [vmem:[#allocation8 + $0xc] sm:$0x3] %vm402_vm0, %v320_v3  ;;  %408 = vst.msk [vmem:[#allocation8 + $0xa] sm:$0x3] %vm402_vm0, %v319_v4 }
 0x129   :  { %417 = vst.msk [vmem:[#allocation8 + $0xa] sm:$0x3] %vm411_vm1, %v399_v47  ;;  %v383_v5 = vpop.permute.xlu0 %382  ;;  %v305_v6 = vpop.permute.xlu1 %304 }
 0x12a   :  { %v400_v7 = vadd.f32 %v383_v5, %v352_v60  ;;  %v321_v8 = vsub.f32 %v209_v49, %v305_v6 }
 0x12c   :  { %418 = vst.msk [vmem:[#allocation8 + $0xc] sm:$0x3] %vm411_vm1, %v400_v7 }
 0x12d   :  { %410 = vst.msk [vmem:[#allocation8 + $0xe] sm:$0x3] %vm402_vm0, %v321_v8  ;;  %v385_v51 = vpop.permute.xlu1 %384 }
 0x12e   :  { %v401_v9 = vadd.f32 %v385_v51, %v353_v10 }
 0x130   :  { %419 = vst.msk [vmem:[#allocation8 + $0xe] sm:$0x3] %vm411_vm1, %v401_v9 }
 0x131   :  { %520 = shalt.err (!%p517_p5)
}
 0x132   :  { %431 = dma.vmem_to_hbm [thread:$0]  %s426_s29, 256, %s716_s3, [#allocation4], %s538_s1, %s538_s1, %s539_s25  }
 0x133   :  { %533 = dma.done.wait [#allocation4], 256  }
 0x134   :  { %534 = vsyncadd [#allocation4], 4294967040 }
 0x135   :  { %435 = vsyncpa [#allocation3], 1 }
 0x136   :  { %436 = vsyncpa [#allocation6], 1 }
 0x137   :  { %437 = vsyncpa [#allocation4], 1 }

</bundles_post_ra>
